<compile_context>
chip_gen: v7x
topology: tpu7x:2x2x1
jax: 0.10.0
libtpu: 0.0.40
codegen_flags: <defaults>
</compile_context>

<pallas_src>
import jax
import jax.numpy as jnp
from jax import lax
from jax.experimental import pallas as pl
from jax.experimental.pallas import tpu as pltpu

# ---- ResampleLoss hyper-params, taken from the module __init__ ----
MAP_ALPHA, MAP_BETA, MAP_GAMMA = 0.1, 10.0, 0.2   # map_param
NEG_SCALE = 2.0                                   # logit_reg['neg_scale']
INIT_BIAS_COEF = 0.05                             # logit_reg['init_bias']
BALANCE_PARAM = 2.0                               # focal['balance_param'] (gamma=2 -> square)
CLS_LOSS_WEIGHT = 2.0                             # loss_weight
NCE_TEMP = 10.0                                   # temp3 in computed_info_nce_batch


def _round_up(x, m):
    return ((x + m - 1) // m) * m


def _pad_rows(x, target_rows):
    pad = target_rows - x.shape[0]
    if pad == 0:
        return x
    return jnp.pad(x, ((0, pad), (0, 0)))


def _make_sentence_kernel(n_valid, n_rows, slab, num_slabs):
    """Build the fused kernel with all shape/loop parameters baked in statically."""
    inv_n = 1.0 / float(n_valid)

    def kernel(pred_ref, tgt_ref, logit_ref, label_ref, freq_inv_ref, bias_ref,
               sim_ref, nce_ref, cls_ref):
        # ---------- contrastive: cosine embedding + bidirectional InfoNCE ----------
        tgt = tgt_ref[...].astype(jnp.float32)                              # (n_rows, D)
        inv_tn_all = lax.rsqrt(jnp.sum(tgt * tgt, axis=1, keepdims=True) + 1e-16)
        tgt_nb = (tgt * inv_tn_all).astype(jnp.bfloat16)                    # normalized, bf16 MXU operand

        col_ids = lax.broadcasted_iota(jnp.int32, (1, n_rows), 1)
        cvalid = (col_ids < n_valid).astype(jnp.float32)                    # (1, n_rows)

        def body(s, carry):
            col_sum, lse_r_sum, sim_sum, diag_sum = carry
            start = s * slab
            start_h = pl.multiple_of(start, slab)
            pred_s = pred_ref[pl.ds(start_h, slab), :].astype(jnp.float32)  # (slab, D)
            tgt_s = tgt_ref[pl.ds(start_h, slab), :].astype(jnp.float32)    # (slab, D)

            dot = jnp.sum(pred_s * tgt_s, axis=1, keepdims=True)            # (slab, 1)
            inv_pn = lax.rsqrt(jnp.sum(pred_s * pred_s, axis=1, keepdims=True) + 1e-16)
            inv_tn = lax.rsqrt(jnp.sum(tgt_s * tgt_s, axis=1, keepdims=True) + 1e-16)
            cos = dot * inv_pn * inv_tn                                      # (slab, 1)

            row_ids = lax.broadcasted_iota(jnp.int32, (slab, 1), 0) + start
            rvalid = (row_ids < n_valid).astype(jnp.float32)                 # (slab, 1)

            sim_sum = sim_sum + jnp.sum((1.0 - cos) * rvalid)
            diag_sum = diag_sum + jnp.sum(cos * rvalid)                      # diag = cos*TEMP reused

            # bf16 MXU matmul (f32 accumulate); pred-side normalization + temperature
            # folded in post-matmul as a rank-1 (slab,1) scale.
            sco = lax.dot_general(pred_s.astype(jnp.bfloat16), tgt_nb,
                                  (((1,), (1,)), ((), ())),
                                  preferred_element_type=jnp.float32)        # (slab, n_rows)
            sco = sco * (inv_pn * NCE_TEMP)

            # scores <= NCE_TEMP, so NCE_TEMP is a safe static softmax max: a single
            # exp pass per slab feeds both the row LSE and the column sums.
            p = jnp.exp(sco - NCE_TEMP) * rvalid * cvalid                    # (slab, n_rows)
            row_sum = jnp.sum(p, axis=1, keepdims=True)                      # (slab, 1)
            lse_r = NCE_TEMP + jnp.log(row_sum + (1.0 - rvalid))             # pad rows -> log(1)=0
            lse_r_sum = lse_r_sum + jnp.sum(lse_r * rvalid)
            col_sum = col_sum + jnp.sum(p, axis=0, keepdims=True)            # (1, n_rows)
            return col_sum, lse_r_sum, sim_sum, diag_sum

        carry = (jnp.zeros((1, n_rows), jnp.float32),
                 jnp.zeros((1, 1), jnp.float32),
                 jnp.zeros((1, 1), jnp.float32),
                 jnp.zeros((1, 1), jnp.float32))
        carry = lax.fori_loop(0, num_slabs, body, carry, unroll=(num_slabs <= 8))
        col_sum, lse_r_sum, sim_sum, diag_sum = carry

        lse_c = NCE_TEMP + jnp.log(col_sum + (1.0 - cvalid))                 # pad cols -> log(1)=0
        lse_c_sum = jnp.sum(lse_c * cvalid)

        sim_ref[0, 0] = sim_sum[0, 0] * inv_n
        nce_ref[0, 0] = (lse_r_sum[0, 0] + lse_c_sum
                         - 2.0 * NCE_TEMP * diag_sum[0, 0]) * inv_n

        # ---------- ResampleLoss (DistributionBalancedLoss), mean reduction ----------
        x = logit_ref[...].astype(jnp.float32)                               # (B, C) logits
        y = label_ref[...].astype(jnp.float32)                               # (B, C) multi-hot
        freq_inv = freq_inv_ref[...]                                         # (1, C)
        init_bias = bias_ref[...]                                            # (1, C)

        # rebalance reweighting (exact divide; matches torch div-by-repeat_rate)
        repeat_rate = jnp.sum(y * freq_inv, axis=1, keepdims=True)           # (B, 1)
        pos_w = freq_inv / repeat_rate                                       # (B, C)
        weight = 1.0 / (1.0 + jnp.exp(-MAP_BETA * (pos_w - MAP_GAMMA))) + MAP_ALPHA

        # logit regularization (neg_scale=2.0, init_bias coeff 0.05), hoisted algebra
        x = (x + init_bias) * (NEG_SCALE - (NEG_SCALE - 1.0) * y)
        weight = weight * ((1.0 / NEG_SCALE) + (1.0 - 1.0 / NEG_SCALE) * y)

        # focal BCE-with-logits (stable); gamma=2 -> explicit square
        bce = jnp.maximum(x, 0.0) - x * y + jnp.log(1.0 + jnp.exp(-jnp.abs(x)))
        q = 1.0 - jnp.exp(-bce)                                              # 1 - pt
        loss = BALANCE_PARAM * (q * q) * (bce * weight)
        cls_ref[0, 0] = CLS_LOSS_WEIGHT * jnp.mean(loss)

    return kernel


def _fused_losses(pred_feats, tgt_feats, pred_topic, tgt_topic, class_freq, train_num):
    n_valid, feat_d = pred_feats.shape
    bsz, n_cls = pred_topic.shape

    # Row-slab sizing: whole matrix for small N (single iteration), 256-row slabs
    # (MXU / lane friendly) for large N.  Only the row axis is padded.
    if n_valid <= 512:
        slab = _round_up(max(n_valid, 1), 8)
        n_rows = slab
    else:
        slab = 256
        n_rows = _round_up(n_valid, slab)
    num_slabs = n_rows // slab

    pred_p = _pad_rows(pred_feats, n_rows)          # no dtype cast, no lane padding
    tgt_p = _pad_rows(tgt_feats, n_rows)

    freq_inv = (1.0 / class_freq).reshape(1, n_cls).astype(jnp.float32)
    init_bias = (-jnp.log(train_num / class_freq - 1.0)
                 * INIT_BIAS_COEF / NEG_SCALE).reshape(1, n_cls).astype(jnp.float32)

    # Explicit scoped-VMEM budget sized to the real working set (+headroom).
    feat_bytes = pred_p.dtype.itemsize
    ws = (2 * n_rows * feat_d * feat_bytes       # pred/tgt inputs resident
          + n_rows * feat_d * 2                  # normalized tgt in bf16
          + 3 * slab * n_rows * 4                # one slab of scores/exp temporaries
          + 8 * n_rows * 4                       # column sums / masks / row stats
          + 8 * bsz * n_cls * 4)                 # ResampleLoss intermediates
    vmem_limit = int(min(128 * 1024 * 1024, max(32 * 1024 * 1024, 2 * ws + (4 << 20))))

    kernel = _make_sentence_kernel(n_valid, n_rows, slab, num_slabs)

    vspec = pl.BlockSpec(memory_space=pltpu.MemorySpace.VMEM)
    sspec = pl.BlockSpec(memory_space=pltpu.MemorySpace.SMEM)

    sim, nce, cls = pl.pallas_call(
        kernel,
        out_shape=(jax.ShapeDtypeStruct((1, 1), jnp.float32),
                   jax.ShapeDtypeStruct((1, 1), jnp.float32),
                   jax.ShapeDtypeStruct((1, 1), jnp.float32)),
        in_specs=[vspec] * 6,
        out_specs=(sspec, sspec, sspec),
        compiler_params=pltpu.CompilerParams(vmem_limit_bytes=vmem_limit),
    )(pred_p, tgt_p, pred_topic, tgt_topic, freq_inv, init_bias)
    return sim[0, 0], nce[0, 0], cls[0, 0]


def sentence_criterion_forward(sent_feats, sent_embeds, sent_num, pred_topic,
                               idx, e_idx, coe, class_freq, train_num):
    """JAX/Pallas equivalent of SentenceCriterion.forward.

    sent_feats, sent_embeds : (bs, max_sent, D)
    sent_num                : python list of ints (static sentence counts per sample)
    pred_topic              : (bs, C) logits
    idx                     : tuple of index arrays selecting the N valid prediction rows
    e_idx                   : tuple of index arrays marking positive topic entries
    """
    bs = sent_feats.shape[0]
    # ---- glue (XLA): gather prediction rows / concatenate valid target rows ----
    pred_feats = sent_feats[idx]                                                # (N, D)
    tgt_feats = jnp.concatenate(
        [sent_embeds[i, :sent_num[i]] for i in range(bs)], axis=0)              # (N, D)
    tgt_topic = jnp.zeros_like(pred_topic, dtype=jnp.float32).at[e_idx].set(1.0)

    sim_loss, nce_loss, cls_loss = _fused_losses(
        pred_feats, tgt_feats, pred_topic, tgt_topic, class_freq, train_num)

    total_loss = coe['sim'] * sim_loss + coe['infoNCE'] * nce_loss + coe['cls'] * cls_loss
    losses_dict = {'total_loss': total_loss, 'sim_loss': sim_loss,
                   'nce_loss': nce_loss, 'cls_loss': cls_loss}
    return total_loss, losses_dict


if __name__ == "__main__":
    key = jax.random.PRNGKey(0)
    bs, max_sent, D, C = 2, 8, 32, 16
    sent_num = [3, 5]                      # N = 8 valid sentences total

    k1, k2, k3 = jax.random.split(key, 3)
    sent_feats = jax.random.normal(k1, (bs, max_sent, D), jnp.float32)
    sent_embeds = jax.random.normal(k2, (bs, max_sent, D), jnp.float32)
    pred_topic = jax.random.normal(k3, (bs, C), jnp.float32)

    # indices of the valid prediction slots (matches sent_num ordering)
    idx = (jnp.array([0, 0, 0, 1, 1, 1, 1, 1]),
           jnp.array([0, 1, 2, 0, 1, 2, 3, 4]))
    # positive topic entries (each sample gets at least one positive class)
    e_idx = (jnp.array([0, 0, 1, 1]), jnp.array([2, 5, 1, 9]))

    coe = {'sim': 1.0, 'infoNCE': 0.5, 'cls': 1.0}

    # deterministic synthetic class-frequency statistics (stand-in for the pkl file)
    class_freq = jnp.arange(3.0, 3.0 + 2 * C, 2.0, dtype=jnp.float32)   # (C,)
    train_num = jnp.float32(100.0)

    total, losses = sentence_criterion_forward(
        sent_feats, sent_embeds, sent_num, pred_topic, idx, e_idx, coe,
        class_freq, train_num)
    jax.block_until_ready(total)
    assert jnp.isfinite(total), "non-finite total loss"
    assert all(jnp.isfinite(v) for v in losses.values()), "non-finite partial loss"
    print("KERNEL_OK")
</pallas_src>

<mosaic_0001>
module attributes {stable_mosaic.version = 11 : i64} {
  func.func @kernel(%arg0: memref<8x32xf32, #tpu.memory_space<vmem>>, %arg1: memref<8x32xf32, #tpu.memory_space<vmem>>, %arg2: memref<2x16xf32, #tpu.memory_space<vmem>>, %arg3: memref<2x16xf32, #tpu.memory_space<vmem>>, %arg4: memref<1x16xf32, #tpu.memory_space<vmem>>, %arg5: memref<1x16xf32, #tpu.memory_space<vmem>>, %arg6: memref<1x1xf32, #tpu.memory_space<smem>>, %arg7: memref<1x1xf32, #tpu.memory_space<smem>>, %arg8: memref<1x1xf32, #tpu.memory_space<smem>>) attributes {dimension_semantics = [], scalar_prefetch = 0 : i64, scratch_operands = 0 : i64, tpu.core_type = #tpu.core_type<tc>} {
    %c0 = arith.constant 0 : index
    %c0_0 = arith.constant 0 : index
    %0 = vector.load %arg1[%c0, %c0_0] : memref<8x32xf32, #tpu.memory_space<vmem>>, vector<8x32xf32>
    %1 = arith.mulf %0, %0 : vector<8x32xf32>
    %cst = arith.constant dense<0.000000e+00> : vector<8xf32>
    %2 = vector.multi_reduction <add>, %1, %cst [1] : vector<8x32xf32> to vector<8xf32>
    %3 = vector.shape_cast %2 : vector<8xf32> to vector<8x1xf32>
    %cst_1 = arith.constant 1.000000e-16 : f32
    %4 = vector.broadcast %cst_1 : f32 to vector<8x1xf32>
    %5 = arith.addf %3, %4 : vector<8x1xf32>
    %6 = math.rsqrt %5 : vector<8x1xf32>
    %7 = vector.broadcast %6 : vector<8x1xf32> to vector<8x32xf32>
    %8 = arith.mulf %0, %7 : vector<8x32xf32>
    %9 = arith.truncf %8 : vector<8x32xf32> to vector<8x32xbf16>
    %10 = tpu.iota {dimensions = array<i32: 1>} : vector<1x8xi32>
    %c8_i32 = arith.constant 8 : i32
    %11 = vector.broadcast %c8_i32 : i32 to vector<1x8xi32>
    %12 = arith.cmpi slt, %10, %11 : vector<1x8xi32>
    %13 = arith.extui %12 : vector<1x8xi1> to vector<1x8xi32>
    %14 = arith.sitofp %13 : vector<1x8xi32> to vector<1x8xf32>
    %cst_2 = arith.constant 0.000000e+00 : f32
    %15 = vector.broadcast %cst_2 : f32 to vector<1x8xf32>
    %cst_3 = arith.constant 0.000000e+00 : f32
    %16 = vector.broadcast %cst_3 : f32 to vector<1x1xf32>
    %cst_4 = arith.constant 0.000000e+00 : f32
    %17 = vector.broadcast %cst_4 : f32 to vector<1x1xf32>
    %cst_5 = arith.constant 0.000000e+00 : f32
    %18 = vector.broadcast %cst_5 : f32 to vector<1x1xf32>
    %c0_i32 = arith.constant 0 : i32
    %c8_i32_6 = arith.constant 8 : i32
    %19 = arith.muli %c0_i32, %c8_i32_6 : i32
    %20 = tpu.assume_multiple %19, 8 : i32
    %21 = arith.index_cast %20 : i32 to index
    %c0_7 = arith.constant 0 : index
    %22 = vector.load %arg0[%21, %c0_7] : memref<8x32xf32, #tpu.memory_space<vmem>>, vector<8x32xf32>
    %23 = arith.index_cast %20 : i32 to index
    %c0_8 = arith.constant 0 : index
    %24 = vector.load %arg1[%23, %c0_8] : memref<8x32xf32, #tpu.memory_space<vmem>>, vector<8x32xf32>
    %25 = arith.mulf %22, %24 : vector<8x32xf32>
    %cst_9 = arith.constant dense<0.000000e+00> : vector<8xf32>
    %26 = vector.multi_reduction <add>, %25, %cst_9 [1] : vector<8x32xf32> to vector<8xf32>
    %27 = vector.shape_cast %26 : vector<8xf32> to vector<8x1xf32>
    %28 = arith.mulf %22, %22 : vector<8x32xf32>
    %cst_10 = arith.constant dense<0.000000e+00> : vector<8xf32>
    %29 = vector.multi_reduction <add>, %28, %cst_10 [1] : vector<8x32xf32> to vector<8xf32>
    %30 = vector.shape_cast %29 : vector<8xf32> to vector<8x1xf32>
    %cst_11 = arith.constant 1.000000e-16 : f32
    %31 = vector.broadcast %cst_11 : f32 to vector<8x1xf32>
    %32 = arith.addf %30, %31 : vector<8x1xf32>
    %33 = math.rsqrt %32 : vector<8x1xf32>
    %34 = arith.mulf %24, %24 : vector<8x32xf32>
    %cst_12 = arith.constant dense<0.000000e+00> : vector<8xf32>
    %35 = vector.multi_reduction <add>, %34, %cst_12 [1] : vector<8x32xf32> to vector<8xf32>
    %36 = vector.shape_cast %35 : vector<8xf32> to vector<8x1xf32>
    %cst_13 = arith.constant 1.000000e-16 : f32
    %37 = vector.broadcast %cst_13 : f32 to vector<8x1xf32>
    %38 = arith.addf %36, %37 : vector<8x1xf32>
    %39 = math.rsqrt %38 : vector<8x1xf32>
    %40 = arith.mulf %27, %33 : vector<8x1xf32>
    %41 = arith.mulf %40, %39 : vector<8x1xf32>
    %42 = tpu.iota {dimensions = array<i32: 0>} : vector<8x1xi32>
    %43 = vector.broadcast %19 : i32 to vector<8x1xi32>
    %44 = arith.addi %42, %43 : vector<8x1xi32>
    %c8_i32_14 = arith.constant 8 : i32
    %45 = vector.broadcast %c8_i32_14 : i32 to vector<8x1xi32>
    %46 = arith.cmpi slt, %44, %45 : vector<8x1xi32>
    %47 = arith.extui %46 : vector<8x1xi1> to vector<8x1xi32>
    %48 = arith.sitofp %47 : vector<8x1xi32> to vector<8x1xf32>
    %cst_15 = arith.constant 1.000000e+00 : f32
    %49 = vector.broadcast %cst_15 : f32 to vector<8x1xf32>
    %50 = arith.subf %49, %41 : vector<8x1xf32>
    %51 = arith.mulf %50, %48 : vector<8x1xf32>
    %52 = vector.shape_cast %51 : vector<8x1xf32> to vector<1x8x1xf32>
    %cst_16 = arith.constant dense<0.000000e+00> : vector<1xf32>
    %53 = vector.multi_reduction <add>, %52, %cst_16 [1, 2] : vector<1x8x1xf32> to vector<1xf32>
    %54 = vector.shape_cast %53 : vector<1xf32> to vector<1x1x1xf32>
    %55 = vector.extract %54[0, 0, 0] : f32 from vector<1x1x1xf32>
    %56 = vector.broadcast %55 : f32 to vector<1x1xf32>
    %57 = arith.addf %17, %56 : vector<1x1xf32>
    %58 = arith.mulf %41, %48 : vector<8x1xf32>
    %59 = vector.shape_cast %58 : vector<8x1xf32> to vector<1x8x1xf32>
    %cst_17 = arith.constant dense<0.000000e+00> : vector<1xf32>
    %60 = vector.multi_reduction <add>, %59, %cst_17 [1, 2] : vector<1x8x1xf32> to vector<1xf32>
    %61 = vector.shape_cast %60 : vector<1xf32> to vector<1x1x1xf32>
    %62 = vector.extract %61[0, 0, 0] : f32 from vector<1x1x1xf32>
    %63 = vector.broadcast %62 : f32 to vector<1x1xf32>
    %64 = arith.addf %18, %63 : vector<1x1xf32>
    %65 = arith.truncf %22 : vector<8x32xf32> to vector<8x32xbf16>
    %cst_18 = arith.constant dense<0.000000e+00> : vector<8x8xf32>
    %66 = tpu.matmul %65, %9, %cst_18 {dimension_numbers = #tpu.dot_dimension_numbers<[1], [1], [0], [0], [0, 0, 1, 0], [], []>} : vector<8x32xbf16>, vector<8x32xbf16>, vector<8x8xf32> -> vector<8x8xf32>
    %cst_19 = arith.constant 1.000000e+01 : f32
    %67 = vector.broadcast %cst_19 : f32 to vector<8x1xf32>
    %68 = arith.mulf %33, %67 : vector<8x1xf32>
    %69 = vector.broadcast %68 : vector<8x1xf32> to vector<8x8xf32>
    %70 = arith.mulf %66, %69 : vector<8x8xf32>
    %cst_20 = arith.constant 1.000000e+01 : f32
    %71 = vector.broadcast %cst_20 : f32 to vector<8x8xf32>
    %72 = arith.subf %70, %71 : vector<8x8xf32>
    %73 = math.exp %72 : vector<8x8xf32>
    %74 = vector.broadcast %48 : vector<8x1xf32> to vector<8x8xf32>
    %75 = arith.mulf %73, %74 : vector<8x8xf32>
    %76 = vector.broadcast %14 : vector<1x8xf32> to vector<8x8xf32>
    %77 = arith.mulf %75, %76 : vector<8x8xf32>
    %cst_21 = arith.constant dense<0.000000e+00> : vector<8xf32>
    %78 = vector.multi_reduction <add>, %77, %cst_21 [1] : vector<8x8xf32> to vector<8xf32>
    %79 = vector.shape_cast %78 : vector<8xf32> to vector<8x1xf32>
    %cst_22 = arith.constant 1.000000e+00 : f32
    %80 = vector.broadcast %cst_22 : f32 to vector<8x1xf32>
    %81 = arith.subf %80, %48 : vector<8x1xf32>
    %82 = arith.addf %79, %81 : vector<8x1xf32>
    %83 = math.log %82 : vector<8x1xf32>
    %cst_23 = arith.constant 1.000000e+01 : f32
    %84 = vector.broadcast %cst_23 : f32 to vector<8x1xf32>
    %85 = arith.addf %84, %83 : vector<8x1xf32>
    %86 = arith.mulf %85, %48 : vector<8x1xf32>
    %87 = vector.shape_cast %86 : vector<8x1xf32> to vector<1x8x1xf32>
    %cst_24 = arith.constant dense<0.000000e+00> : vector<1xf32>
    %88 = vector.multi_reduction <add>, %87, %cst_24 [1, 2] : vector<1x8x1xf32> to vector<1xf32>
    %89 = vector.shape_cast %88 : vector<1xf32> to vector<1x1x1xf32>
    %90 = vector.extract %89[0, 0, 0] : f32 from vector<1x1x1xf32>
    %91 = vector.broadcast %90 : f32 to vector<1x1xf32>
    %92 = arith.addf %16, %91 : vector<1x1xf32>
    %cst_25 = arith.constant dense<0.000000e+00> : vector<8xf32>
    %93 = vector.multi_reduction <add>, %77, %cst_25 [0] : vector<8x8xf32> to vector<8xf32>
    %94 = vector.shape_cast %93 : vector<8xf32> to vector<1x8xf32>
    %95 = arith.addf %15, %94 : vector<1x8xf32>
    %c1_i32 = arith.constant 1 : i32
    %cst_26 = arith.constant 1.000000e+00 : f32
    %96 = vector.broadcast %cst_26 : f32 to vector<1x8xf32>
    %97 = arith.subf %96, %14 : vector<1x8xf32>
    %98 = arith.addf %95, %97 : vector<1x8xf32>
    %99 = math.log %98 : vector<1x8xf32>
    %cst_27 = arith.constant 1.000000e+01 : f32
    %100 = vector.broadcast %cst_27 : f32 to vector<1x8xf32>
    %101 = arith.addf %100, %99 : vector<1x8xf32>
    %102 = arith.mulf %101, %14 : vector<1x8xf32>
    %103 = vector.shape_cast %102 : vector<1x8xf32> to vector<1x1x8xf32>
    %cst_28 = arith.constant dense<0.000000e+00> : vector<1xf32>
    %104 = vector.multi_reduction <add>, %103, %cst_28 [1, 2] : vector<1x1x8xf32> to vector<1xf32>
    %105 = vector.shape_cast %104 : vector<1xf32> to vector<1x1x1xf32>
    %106 = vector.extract %105[0, 0, 0] : f32 from vector<1x1x1xf32>
    %107 = vector.extract %57[0, 0] : f32 from vector<1x1xf32>
    %cst_29 = arith.constant 1.250000e-01 : f32
    %108 = arith.mulf %107, %cst_29 : f32
    %c0_30 = arith.constant 0 : index
    %c0_31 = arith.constant 0 : index
    %109 = memref.load %arg6[%c0_30, %c0_31] : memref<1x1xf32, #tpu.memory_space<smem>>
    memref.store %108, %arg6[%c0_30, %c0_31] : memref<1x1xf32, #tpu.memory_space<smem>>
    %110 = vector.extract %92[0, 0] : f32 from vector<1x1xf32>
    %111 = arith.addf %110, %106 : f32
    %112 = vector.extract %64[0, 0] : f32 from vector<1x1xf32>
    %cst_32 = arith.constant 2.000000e+01 : f32
    %113 = arith.mulf %cst_32, %112 : f32
    %114 = arith.subf %111, %113 : f32
    %cst_33 = arith.constant 1.250000e-01 : f32
    %115 = arith.mulf %114, %cst_33 : f32
    %c0_34 = arith.constant 0 : index
    %c0_35 = arith.constant 0 : index
    %116 = memref.load %arg7[%c0_34, %c0_35] : memref<1x1xf32, #tpu.memory_space<smem>>
    memref.store %115, %arg7[%c0_34, %c0_35] : memref<1x1xf32, #tpu.memory_space<smem>>
    %c0_36 = arith.constant 0 : index
    %c0_37 = arith.constant 0 : index
    %117 = vector.load %arg2[%c0_36, %c0_37] : memref<2x16xf32, #tpu.memory_space<vmem>>, vector<2x16xf32>
    %c0_38 = arith.constant 0 : index
    %c0_39 = arith.constant 0 : index
    %118 = vector.load %arg3[%c0_38, %c0_39] : memref<2x16xf32, #tpu.memory_space<vmem>>, vector<2x16xf32>
    %c0_40 = arith.constant 0 : index
    %c0_41 = arith.constant 0 : index
    %119 = vector.load %arg4[%c0_40, %c0_41] : memref<1x16xf32, #tpu.memory_space<vmem>>, vector<1x16xf32>
    %c0_42 = arith.constant 0 : index
    %c0_43 = arith.constant 0 : index
    %120 = vector.load %arg5[%c0_42, %c0_43] : memref<1x16xf32, #tpu.memory_space<vmem>>, vector<1x16xf32>
    %121 = vector.broadcast %119 : vector<1x16xf32> to vector<2x16xf32>
    %122 = arith.mulf %118, %121 : vector<2x16xf32>
    %cst_44 = arith.constant dense<0.000000e+00> : vector<2xf32>
    %123 = vector.multi_reduction <add>, %122, %cst_44 [1] : vector<2x16xf32> to vector<2xf32>
    %124 = vector.shape_cast %123 : vector<2xf32> to vector<2x1xf32>
    %125 = vector.broadcast %119 : vector<1x16xf32> to vector<2x16xf32>
    %126 = vector.broadcast %124 : vector<2x1xf32> to vector<2x16xf32>
    %127 = arith.divf %125, %126 : vector<2x16xf32>
    %cst_45 = arith.constant 2.000000e-01 : f32
    %128 = vector.broadcast %cst_45 : f32 to vector<2x16xf32>
    %129 = arith.subf %127, %128 : vector<2x16xf32>
    %cst_46 = arith.constant -1.000000e+01 : f32
    %130 = vector.broadcast %cst_46 : f32 to vector<2x16xf32>
    %131 = arith.mulf %130, %129 : vector<2x16xf32>
    %132 = math.exp %131 : vector<2x16xf32>
    %cst_47 = arith.constant 1.000000e+00 : f32
    %133 = vector.broadcast %cst_47 : f32 to vector<2x16xf32>
    %134 = arith.addf %133, %132 : vector<2x16xf32>
    %cst_48 = arith.constant 1.000000e+00 : f32
    %135 = vector.broadcast %cst_48 : f32 to vector<2x16xf32>
    %136 = arith.divf %135, %134 : vector<2x16xf32>
    %cst_49 = arith.constant 1.000000e-01 : f32
    %137 = vector.broadcast %cst_49 : f32 to vector<2x16xf32>
    %138 = arith.addf %136, %137 : vector<2x16xf32>
    %139 = vector.broadcast %120 : vector<1x16xf32> to vector<2x16xf32>
    %140 = arith.addf %117, %139 : vector<2x16xf32>
    %cst_50 = arith.constant 1.000000e+00 : f32
    %141 = vector.broadcast %cst_50 : f32 to vector<2x16xf32>
    %142 = arith.mulf %141, %118 : vector<2x16xf32>
    %cst_51 = arith.constant 2.000000e+00 : f32
    %143 = vector.broadcast %cst_51 : f32 to vector<2x16xf32>
    %144 = arith.subf %143, %142 : vector<2x16xf32>
    %145 = arith.mulf %140, %144 : vector<2x16xf32>
    %cst_52 = arith.constant 5.000000e-01 : f32
    %146 = vector.broadcast %cst_52 : f32 to vector<2x16xf32>
    %147 = arith.mulf %146, %118 : vector<2x16xf32>
    %cst_53 = arith.constant 5.000000e-01 : f32
    %148 = vector.broadcast %cst_53 : f32 to vector<2x16xf32>
    %149 = arith.addf %148, %147 : vector<2x16xf32>
    %150 = arith.mulf %138, %149 : vector<2x16xf32>
    %cst_54 = arith.constant 0.000000e+00 : f32
    %151 = vector.broadcast %cst_54 : f32 to vector<2x16xf32>
    %152 = arith.maximumf %145, %151 : vector<2x16xf32>
    %153 = arith.mulf %145, %118 : vector<2x16xf32>
    %154 = arith.subf %152, %153 : vector<2x16xf32>
    %155 = math.absf %145 : vector<2x16xf32>
    %cst_55 = arith.constant 0.000000e+00 : f32
    %156 = vector.broadcast %cst_55 : f32 to vector<2x16xf32>
    %157 = arith.subf %156, %155 : vector<2x16xf32>
    %158 = math.exp %157 : vector<2x16xf32>
    %cst_56 = arith.constant 1.000000e+00 : f32
    %159 = vector.broadcast %cst_56 : f32 to vector<2x16xf32>
    %160 = arith.addf %159, %158 : vector<2x16xf32>
    %161 = math.log %160 : vector<2x16xf32>
    %162 = arith.addf %154, %161 : vector<2x16xf32>
    %cst_57 = arith.constant 0.000000e+00 : f32
    %163 = vector.broadcast %cst_57 : f32 to vector<2x16xf32>
    %164 = arith.subf %163, %162 : vector<2x16xf32>
    %165 = math.exp %164 : vector<2x16xf32>
    %cst_58 = arith.constant 1.000000e+00 : f32
    %166 = vector.broadcast %cst_58 : f32 to vector<2x16xf32>
    %167 = arith.subf %166, %165 : vector<2x16xf32>
    %168 = arith.mulf %167, %167 : vector<2x16xf32>
    %cst_59 = arith.constant 2.000000e+00 : f32
    %169 = vector.broadcast %cst_59 : f32 to vector<2x16xf32>
    %170 = arith.mulf %169, %168 : vector<2x16xf32>
    %171 = arith.mulf %162, %150 : vector<2x16xf32>
    %172 = arith.mulf %170, %171 : vector<2x16xf32>
    %173 = vector.shape_cast %172 : vector<2x16xf32> to vector<1x2x16xf32>
    %cst_60 = arith.constant dense<0.000000e+00> : vector<1xf32>
    %174 = vector.multi_reduction <add>, %173, %cst_60 [1, 2] : vector<1x2x16xf32> to vector<1xf32>
    %175 = vector.shape_cast %174 : vector<1xf32> to vector<1x1x1xf32>
    %176 = vector.extract %175[0, 0, 0] : f32 from vector<1x1x1xf32>
    %cst_61 = arith.constant 3.200000e+01 : f32
    %177 = arith.divf %176, %cst_61 : f32
    %cst_62 = arith.constant 2.000000e+00 : f32
    %178 = arith.mulf %cst_62, %177 : f32
    %c0_63 = arith.constant 0 : index
    %c0_64 = arith.constant 0 : index
    %179 = memref.load %arg8[%c0_63, %c0_64] : memref<1x1xf32, #tpu.memory_space<smem>>
    memref.store %178, %arg8[%c0_63, %c0_64] : memref<1x1xf32, #tpu.memory_space<smem>>
    return
  }
}

</mosaic_0001>

<bundles_post_ra>
// kernel: tpu_custom_call.1
= control target key start
LH: loop header
LB: loop body
LE: loop exit
PB: predicated region body
PF: predicated region fallthrough
CT: control target
= control target key end

     0   :  { %14 = vsyncpa [#allocation3], 0  ;;  %s624_s0 = inlined_call_operand.hbm [shape: f32[8,32], index: 0, kind: input, shape index: {}]   ;;  %s625_s1 = inlined_call_operand.hbm [shape: f32[8,32], index: 1, kind: input, shape index: {}]   ;;  %s626_s2 = inlined_call_operand.vmem [shape: f32[2,16], index: 2, kind: input, shape index: {}]   ;;  %s627_s3 = inlined_call_operand.vmem [shape: f32[2,16], index: 3, kind: input, shape index: {}]   ;;  %s628_s4 = inlined_call_operand.vmem [shape: f32[1,16], index: 4, kind: input, shape index: {}]   ;;  %s629_s5 = inlined_call_operand.vmem [shape: f32[1,16], index: 5, kind: input, shape index: {}]   ;;  %s630_s6 = inlined_call_operand.hbm [shape: f32[1,1], index: 6, kind: output, shape index: {0}]   ;;  %s631_s7 = inlined_call_operand.hbm [shape: f32[1,1], index: 7, kind: output, shape index: {1}]   ;;  %s632_s8 = inlined_call_operand.hbm [shape: f32[1,1], index: 8, kind: output, shape index: {2}]  }
   0x1   :  { %15 = vsyncpa [#allocation6], 0 }
   0x2   :  { %16 = vsyncpa [#allocation4], 0 }
   0x3   :  { %17 = vsyncpa [#allocation9], 0  ;;  %s480_s27 = smov [#allocation2]   ;;  %s481_s29 = smov [#allocation5]  }
   0x4   :  { %s24_s28 = sshll.u32 %s480_s27, 4  ;;  %s34_s30 = sshll.u32 %s481_s29, 4  ;;  %s25_s28 = int_to_ptr.vmem [resolvable:$true] %s24_s28  ;;  %s35_s30 = int_to_ptr.vmem [resolvable:$true] %s34_s30 }
   0x5   :  { %s398_s11 = scalar_lea.hbm %s624_s0, 128 }
   0x6   :  { %p399_p0 = scmp.ne.s32.totalorder %s624_s0, %s398_s11  ;;  %p402_p1 = scmp.lt.u32.totalorder %s398_s11, %s624_s0 }
   0x8   :  { %p404_p2 = pnand %p402_p1, %p399_p0 }
   0xa   :  { %407 = shalt.err (!%p404_p2)
}
   0xb   :  { %s408_s16 = scalar_lea.vmem %s25_s28, 128  ;;  %p413_p4 = scmp.lt.s32.totalorder %s25_s28, %s25_s28 }
   0xc   :  { %p409_p3 = scmp.ne.s32.totalorder %s25_s28, %s408_s16  ;;  %p414_p5 = scmp.lt.s32.totalorder %s408_s16, %s408_s16 }
   0xe   :  { %p415_p6 = por %p414_p5, %p413_p4 }
  0x10   :  { %p416_p7 = pnand %p415_p6, %p409_p3 }
  0x12   :  { %419 = shalt.err (!%p416_p7)
}
  0x13   :  { %27 = dma.hbm_to_vmem [thread:$0]  %s624_s0, 128, %s25_s28, [#allocation3]  }
  0x14   :  { %s420_s21 = scalar_lea.hbm %s625_s1, 128 }
  0x15   :  { %p421_p8 = scmp.ne.s32.totalorder %s625_s1, %s420_s21  ;;  %p424_p9 = scmp.lt.u32.totalorder %s420_s21, %s625_s1 }
  0x17   :  { %p426_p10 = pnand %p424_p9, %p421_p8 }
  0x19   :  { %429 = shalt.err (!%p426_p10)
}
  0x1a   :  { %s430_s26 = scalar_lea.vmem %s35_s30, 128  ;;  %p435_p12 = scmp.lt.s32.totalorder %s35_s30, %s35_s30 }
  0x1b   :  { %p431_p11 = scmp.ne.s32.totalorder %s35_s30, %s430_s26  ;;  %p436_p13 = scmp.lt.s32.totalorder %s430_s26, %s430_s26 }
  0x1d   :  { %p437_p0 = por %p436_p13, %p435_p12 }
  0x1f   :  { %p438_p1 = pnand %p437_p0, %p431_p11 }
  0x21   :  { %441 = shalt.err (!%p438_p1)
}
  0x22   :  { %37 = dma.hbm_to_vmem [thread:$0]  %s625_s1, 128, %s35_s30, [#allocation6]  }
  0x23   :  { %472 = dma.done.wait [#allocation3], 128  }
  0x24   :  { %473 = vsyncadd [#allocation3], 4294967168 }
  0x25   :  { %474 = dma.done.wait [#allocation6], 128  }
  0x26   :  { %475 = vsyncadd [#allocation6], 4294967168  ;;  %v53_v0 = vld [vmem:[#allocation5] sm:$0xff]  ;;  %vm55_vm0 = vcmask 261120   ;;  %v482_v3 = vmov 0.0   ;;  %vm483_vm1 = vmmov 0   ;;  %v63_v38 = vlaneseq }
  0x27   :  { %v54_v1 = vmul.f32 %v53_v0, %v53_v0  ;;  %351 = vmatprep.subr.bf16.mxu0 %v482_v3  ;;  %353 = vmatprep.mubr.msk.bf16.mxu0 %vm483_vm1, %v482_v3  ;;  %v68_v4 = vld [vmem:[#allocation2] sm:$0xff]  ;;  %vm244_vm2 = vcmask 123904   ;;  %vm95_vm3 = vcmask 7168   ;;  %vm175_vm5 = vcmask 64512   ;;  %s442_s13 = scalar_lea.hbm %s630_s6, 16 }
  0x28   :  { %v560_v5 = vld [vmem:[%s627_s3] sm:$0x3]  ;;  %v74_v7 = vmul.f32 %v68_v4, %v68_v4  ;;  %v70_v11 = vmul.f32 %v68_v4, %v53_v0  ;;  %v121_v19 = vpack.c.bf16 %v68_v4, %v68_v4  ;;  %v64_v40 = vand.u32 127, %v63_v38  ;;  %p443_p2 = scmp.ne.s32.totalorder %s630_s6, %s442_s13  ;;  %p446_p3 = scmp.lt.u32.totalorder %s442_s13, %s630_s6 }
  0x29   :  { %v56_v2 = vsel %vm55_vm0, %v54_v1, 0.0  ;;  %v565_v6 = vld [vmem:[%s628_s4] ss:$0 sm:$0xff]  ;;  %vm210_vm6 = vcmask 57344   ;;  %v265_v62 = vsub.f32 2.0, %v560_v5 }
  0x2a   :  { %57 = vadd.xlane.f32.xlu0 %v56_v2  ;;  %v243_v8 = vmul.f32 %v565_v6, %v560_v5  ;;  %v75_v9 = vsel %vm55_vm0, %v74_v7, 0.0  ;;  %v71_v12 = vsel %vm55_vm0, %v70_v11, 0.0  ;;  %vm65_vm4 = vcmp.lt.s32.totalorder %v64_v40, 8  ;;  %v348_v60 = vld [vmem:[%s629_s5] ss:$0 sm:$0xff]  ;;  %p448_p4 = pnand %p446_p3, %p443_p2 }
  0x2b   :  { %v343_v41 = vsel %vm65_vm4, 1.0, %v482_v3  ;;  %v233_v61 = vld [vmem:[%s626_s2] sm:$0x3] }
  0x2c   :  { %v245_v10 = vsel %vm244_vm2, %v243_v8, 0.0  ;;  %v204_v51 = vsub.f32 1.0, %v343_v41  ;;  %v264_v63 = vadd.f32 %v348_v60, %v233_v61 }
  0x2d   :  { %246 = vadd.xlane.f32.xlu1 %v245_v10 }
  0x2e   :  { %76 = vadd.xlane.f32.xlu0 %v75_v9 }
  0x31   :  { %82 = vadd.xlane.f32.xlu1 %v56_v2 }
  0x35   :  { %72 = vadd.xlane.f32.xlu1 %v71_v12 }
  0xb7   :  { %v58_v13 = vpop.xlane.xlu0 %57 }
  0xb8   :  { %v59_v14 = vadd.f32 1e-16, %v58_v13 }
  0xba   :  { %374 = vrsqrt.f32 %v59_v14  ;;  %v247_v21 = vpop.xlane.xlu1 %246 }
  0xbb   :  { %v77_v20 = vpop.xlane.xlu0 %76 }
  0xbc   :  { %v78_v22 = vadd.f32 1e-16, %v77_v20 }
  0xbe   :  { %376 = vrsqrt.f32 %v78_v22  ;;  %v83_v23 = vpop.xlane.xlu1 %82 }
  0xbf   :  { %v84_v24 = vadd.f32 1e-16, %v83_v23 }
  0xc1   :  { %378 = vrsqrt.f32 %v84_v24 }
  0xc2   :  { %v73_v25 = vpop.xlane.xlu1 %72 }
  0xc4   :  { %v375_v15 = vpop.eup %374 }
  0xc5   :  { %v61_v16 = vmul.f32 %v375_v15, %v53_v0  ;;  %v266_v0 = vmul.f32 %v265_v62, %v264_v63 }
  0xc7   :  { %v62_v17 = vpack.c.bf16 %v61_v16, %v61_v16  ;;  %v273_v1 = vand.u32 2147483647, %v266_v0  ;;  %v271_v13 = vmul.f32 %v266_v0, %v560_v5  ;;  %v270_v14 = vmax.f32 %v266_v0, 0.0 }
  0xc8   :  { %v377_v26 = vpop.eup %376 }
  0xc9   :  { %v126_v18 = vsel %vm55_vm0, %v62_v17, 0  ;;  %v86_v27 = vmul.f32 %v377_v26, %v73_v25  ;;  %v168_v31 = vmul.f32 10.0, %v377_v26  ;;  %v274_v2 = vsub.f32 0.0, %v273_v1 }
  0xca   :  { %352 = vmatpush3.bf16.xpose.msra.mxu0 %v126_v18  ;;  %v272_v16 = vsub.f32 %v270_v14, %v271_v13  ;;  %v267_v25 = vmul.f32 0.5, %v560_v5 }
  0xcb   :  { %v379_v28 = vpop.eup %378  ;;  %v275_v3 = vmul.f32 1.442695, %v274_v2 }
  0xcc   :  { %v87_v29 = vmul.f32 %v379_v28, %v86_v27 }
  0xce   :  { %v109_v30 = vsel %vm95_vm3, %v87_v29, 0.0  ;;  %v93_v45 = vsub.f32 1.0, %v87_v29 }
  0xcf   :  { %110 = vadd.xlane.f32.xlu1 %v109_v30  ;;  %v268_v30 = vadd.f32 0.5, %v267_v25 }
  0xd0   :  { %v96_v48 = vsel %vm95_vm3, %v93_v45, 0.0 }
  0xd1   :  { %354 = vmatmul.mubr.msk.bf16.vlgmr.msra.gmra.mrb[0].mxu0 %vm55_vm0, %v121_v19 }
 0x1a4   :  { %v162_v32 = vpop.f32.mrb[0].mxu0 }
 0x1a5   :  { %v169_v33 = vmul.f32 %v168_v31, %v162_v32  ;;  %v355_v34 = vpop.f32.mrb[1].mxu0 }
 0x1a6   :  { %v165_v35 = vpop.f32.mrb[2].mxu0 }
 0x1a7   :  { %v345_v36 = vadd.f32 -10.0, %v169_v33  ;;  %v356_v37 = vpop.f32.mrb[3].mxu0 }
 0x1a9   :  { %v171_v39 = vmul.f32 1.442695, %v345_v36 }
 0x1ab   :  { %380 = vpow2.f32 %v171_v39 }
 0x1b5   :  { %v381_v42 = vpop.eup %380 }
 0x1b6   :  { %v174_v43 = vmul.f32 %v381_v42, %v343_v41 }
 0x1b8   :  { %v176_v44 = vsel %vm175_vm5, %v174_v43, 0.0 }
 0x1b9   :  { %177 = vadd.xlane.f32.xlu0 %v176_v44  ;;  %v197_v46 = vrot.slane %v176_v44, 4 }
 0x1bb   :  { %v198_v47 = vadd.f32 %v197_v46, %v176_v44 }
 0x1bd   :  { %v199_v49 = vrot.slane %v198_v47, 2  ;;  %97 = vadd.xlane.f32.xlu0 %v96_v48 }
 0x1bf   :  { %v200_v50 = vadd.f32 %v199_v49, %v198_v47 }
 0x1c1   :  { %v201_v52 = vrot.slane %v200_v50, 1 }
 0x1c3   :  { %v202_v53 = vadd.f32 %v201_v52, %v200_v50 }
 0x1c5   :  { %v205_v54 = vadd.f32 %v204_v51, %v202_v53 }
 0x1c7   :  { %382 = vlog2.f32 %v205_v54 }
 0x1c8   :  { %384 = vrcp.f32 %v247_v21 }
 0x1c9   :  { %386 = vpow2.f32 %v275_v3 }
 0x1d1   :  { %v383_v55 = vpop.eup %382 }
 0x1d2   :  { %v207_v56 = vmul.f32 0.6931472, %v383_v55  ;;  %v385_v4 = vpop.eup %384 }
 0x1d3   :  { %v387_v7 = vpop.eup %386  ;;  %v249_v8 = vmul.f32 %v385_v4, %v565_v6  ;;  %v111_v6 = vpop.xlane.xlu1 %110 }
 0x1d4   :  { %v208_v57 = vadd.f32 10.0, %v207_v56  ;;  %v277_v9 = vadd.f32 1.0, %v387_v7  ;;  %v112_v23 = vrot.slane %v111_v6, 4 }
 0x1d5   :  { %v347_v10 = vadd.f32 -0.2, %v249_v8 }
 0x1d6   :  { %v209_v58 = vmul.f32 %v343_v41, %v208_v57  ;;  %388 = vlog2.f32 %v277_v9  ;;  %v113_v27 = vadd.f32 %v112_v23, %v111_v6 }
 0x1d7   :  { %v251_v11 = vmul.f32 -10.0, %v347_v10 }
 0x1d8   :  { %v211_v59 = vsel %vm210_vm6, %v209_v58, 0.0  ;;  %v114_v32 = vrot.slane %v113_v27, 2 }
 0x1d9   :  { %212 = vadd.xlane.f32.xlu1 %v211_v59  ;;  %v252_v12 = vmul.f32 1.442695, %v251_v11 }
 0x1da   :  { %v115_v38 = vadd.f32 %v114_v32, %v113_v27 }
 0x1db   :  { %390 = vpow2.f32 %v252_v12 }
 0x1dc   :  { %v116_v44 = vrot.slane %v115_v38, 1 }
 0x1de   :  { %v117_v50 = vadd.f32 %v116_v44, %v115_v38 }
 0x1e0   :  { %v389_v15 = vpop.eup %388 }
 0x1e1   :  { %v279_v17 = vmul.f32 0.6931472, %v389_v15 }
 0x1e3   :  { %v280_v18 = vadd.f32 %v279_v17, %v272_v16 }
 0x1e5   :  { %v391_v19 = vpop.eup %390  ;;  %v281_v20 = vsub.f32 0.0, %v280_v18 }
 0x1e6   :  { %v254_v21 = vadd.f32 1.0, %v391_v19 }
 0x1e7   :  { %v282_v22 = vmul.f32 1.442695, %v281_v20 }
 0x1e8   :  { %392 = vrcp.f32 %v254_v21 }
 0x1e9   :  { %394 = vpow2.f32 %v282_v22 }
 0x1f2   :  { %v393_v24 = vpop.eup %392 }
 0x1f3   :  { %v395_v26 = vpop.eup %394  ;;  %v257_v29 = vadd.f32 0.1, %v393_v24 }
 0x1f4   :  { %v284_v31 = vsub.f32 1.0, %v395_v26 }
 0x1f5   :  { %v269_v35 = vmul.f32 %v268_v30, %v257_v29 }
 0x1f6   :  { %v285_v36 = vmul.f32 %v284_v31, %v284_v31 }
 0x1f7   :  { %v287_v41 = vmul.f32 %v280_v18, %v269_v35 }
 0x1f8   :  { %v286_v40 = vmul.f32 2.0, %v285_v36 }
 0x1fa   :  { %v288_v47 = vmul.f32 %v287_v41, %v286_v40 }
 0x1fc   :  { %v289_v51 = vsel %vm244_vm2, %v288_v47, 0.0 }
 0x246   :  { %v178_v28 = vpop.xlane.xlu0 %177 }
 0x247   :  { %396 = vlog2.f32 %v178_v28 }
 0x24a   :  { %v98_v33 = vpop.xlane.xlu0 %97 }
 0x24b   :  { %v99_v34 = vrot.slane %v98_v33, 4 }
 0x24d   :  { %v100_v37 = vadd.f32 %v99_v34, %v98_v33 }
 0x24f   :  { %v101_v39 = vrot.slane %v100_v37, 2 }
 0x251   :  { %v397_v42 = vpop.eup %396  ;;  %v102_v43 = vadd.f32 %v101_v39, %v100_v37 }
 0x252   :  { %v182_v5 = vmul.f32 0.6931472, %v397_v42 }
 0x253   :  { %v103_v45 = vrot.slane %v102_v43, 1 }
 0x254   :  { %v183_v46 = vadd.f32 10.0, %v182_v5 }
 0x255   :  { %v104_v48 = vadd.f32 %v103_v45, %v102_v43 }
 0x256   :  { %v185_v49 = vsel %vm95_vm3, %v183_v46, 0.0 }
 0x257   :  { %186 = vadd.xlane.f32.xlu0 %v185_v49  ;;  %357 = vpush %v104_v48 }
 0x258   :  { %359 = vpush %v117_v50 }
 0x25b   :  { %290 = vadd.xlane.f32.xlu0 %v289_v51 }
 0x288   :  { %s358_s2 = spop %357 }
 0x289   :  { %s222_s5 = smul.f32 0.125, %s358_s2 }
 0x28b   :  { %224 = sst [smem:[#allocation7]] %s222_s5 }
 0x28c   :  { %451 = shalt.err (!%p448_p4)
}
 0x28d   :  { %s484_s18 = smov [#allocation7]   ;;  %v213_v52 = vpop.xlane.xlu1 %212  ;;  %s452_s30 = scalar_lea.hbm %s631_s7, 16 }
 0x28e   :  { %312 = dma.smem_to_hbm %s484_s18, 16, %s630_s6, [#allocation4]   ;;  %v214_v53 = vrot.slane %v213_v52, 4 }
 0x28f   :  { %s360_s6 = spop %359  ;;  %p453_p5 = scmp.ne.s32.totalorder %s631_s7, %s452_s30 }
 0x290   :  { %v215_v54 = vadd.f32 %v214_v53, %v213_v52  ;;  %s228_s23 = smul.f32 20.0, %s360_s6  ;;  %p456_p6 = scmp.lt.u32.totalorder %s452_s30, %s631_s7 }
 0x292   :  { %v216_v55 = vrot.slane %v215_v54, 2  ;;  %p458_p7 = pnand %p456_p6, %p453_p5 }
 0x294   :  { %v217_v59 = vadd.f32 %v216_v55, %v215_v54 }
 0x296   :  { %v218_v1 = vrot.slane %v217_v59, 1 }
 0x298   :  { %v219_v8 = vadd.f32 %v218_v1, %v217_v59 }
 0x2e4   :  { %v187_v56 = vpop.xlane.xlu0 %186 }
 0x2e5   :  { %v188_v57 = vrot.slane %v187_v56, 4 }
 0x2e7   :  { %v189_v58 = vadd.f32 %v188_v57, %v187_v56 }
 0x2e8   :  { %v291_v60 = vpop.xlane.xlu0 %290 }
 0x2e9   :  { %v190_v61 = vrot.slane %v189_v58, 2  ;;  %v292_v62 = vrot.slane %v291_v60, 4 }
 0x2eb   :  { %v293_v63 = vadd.f32 %v292_v62, %v291_v60  ;;  %v191_v0 = vadd.f32 %v190_v61, %v189_v58 }
 0x2ed   :  { %v294_v2 = vrot.slane %v293_v63, 2  ;;  %v192_v3 = vrot.slane %v191_v0, 1 }
 0x2ef   :  { %v295_v4 = vadd.f32 %v294_v2, %v293_v63  ;;  %v193_v7 = vadd.f32 %v192_v3, %v191_v0 }
 0x2f1   :  { %361 = vpush %v193_v7  ;;  %v296_v9 = vrot.slane %v295_v4, 1 }
 0x2f2   :  { %363 = vpush %v219_v8 }
 0x2f3   :  { %v297_v10 = vadd.f32 %v296_v9, %v295_v4 }
 0x2f5   :  { %365 = vpush %v297_v10 }
 0x322   :  { %s362_s21 = spop %361 }
 0x323   :  { %s364_s22 = spop %363 }
 0x324   :  { %s226_s24 = sadd.f32 %s364_s22, %s362_s21 }
 0x326   :  { %s229_s25 = ssub.f32 %s226_s24, %s228_s23  ;;  %s366_s26 = spop %365 }
 0x327   :  { %s301_s0 = smul.f32 0.03125, %s366_s26 }
 0x328   :  { %s230_s27 = smul.f32 0.125, %s229_s25 }
 0x329   :  { %s302_s28 = smul.f32 2.0, %s301_s0 }
 0x32a   :  { %232 = sst [smem:[#allocation8]] %s230_s27 }
 0x32b   :  { %304 = sst [smem:[#allocation10]] %s302_s28 }
 0x32c   :  { %461 = shalt.err (!%p458_p7)
}
 0x32d   :  { %s485_s2 = smov [#allocation8]   ;;  %s462_s14 = scalar_lea.hbm %s632_s8, 16 }
 0x32e   :  { %320 = dma.smem_to_hbm %s485_s2, 16, %s631_s7, [#allocation9]  }
 0x32f   :  { %p463_p8 = scmp.ne.s32.totalorder %s632_s8, %s462_s14  ;;  %p466_p9 = scmp.lt.u32.totalorder %s462_s14, %s632_s8 }
 0x331   :  { %p468_p10 = pnand %p466_p9, %p463_p8 }
 0x333   :  { %471 = shalt.err (!%p468_p10)
}
 0x334   :  { %s486_s19 = smov [#allocation10]  }
 0x335   :  { %328 = dma.smem_to_hbm %s486_s19, 16, %s632_s8, [#allocation9]  }
 0x336   :  { %476 = dma.done.wait [#allocation4], 16  }
 0x337   :  { %477 = vsyncadd [#allocation4], 4294967280 }
 0x338   :  { %478 = dma.done.wait [#allocation9], 32  }
 0x339   :  { %479 = vsyncadd [#allocation9], 4294967264 }
 0x33a   :  { %338 = sfence }
 0x33b   :  { %339 = vsyncpa [#allocation3], 1 }
 0x33c   :  { %340 = vsyncpa [#allocation6], 1 }
 0x33d   :  { %341 = vsyncpa [#allocation4], 1 }
 0x33e   :  { %342 = vsyncpa [#allocation9], 1 }

</bundles_post_ra>
